<compile_context>
chip_gen: v7x
topology: tpu7x:2x2x1
jax: 0.10.0
libtpu: 0.0.40
codegen_flags: <defaults>
</compile_context>

<pallas_src>
import functools

import jax
import jax.numpy as jnp
from jax.experimental import pallas as pl
from jax.experimental.pallas import tpu as pltpu


# ---------------------------------------------------------------------------
# Kernels
# ---------------------------------------------------------------------------
def project_kernel(x_ref, w_ref, o_ref):
    """Row-tiled dense projection: o = x @ w (bf16 in, f32 accumulate, bf16 out)."""
    o_ref[...] = jnp.dot(
        x_ref[...], w_ref[...], preferred_element_type=jnp.float32
    ).astype(o_ref.dtype)


def propagate_kernel(a_ref, xw_ref, b_ref, o_ref, *, epilogue, num_valid):
    """Row-tiled propagation: acc = a_tile @ xw + b, then relu or masked log_softmax.

    a_ref  : (TM, N_pad)   bf16 row block of normalized adjacency
    xw_ref : (N_pad, Cp)   bf16 resident (precomputed X@W / H1@W)
    b_ref  : (1, Cp)       f32 bias
    o_ref  : (TM, Cp)      bf16 (relu pass) or f32 (log_softmax pass)
    """
    acc = jnp.dot(a_ref[...], xw_ref[...], preferred_element_type=jnp.float32)
    acc = acc + b_ref[...]

    if epilogue == "relu":
        o_ref[...] = jnp.maximum(acc, 0.0).astype(o_ref.dtype)
    else:  # masked, numerically-stable log_softmax over the first `num_valid` lanes
        lane = jax.lax.broadcasted_iota(jnp.int32, acc.shape, 1)
        z = jnp.where(lane < num_valid, acc, jnp.full_like(acc, -1e30))
        m = jnp.max(z, axis=1, keepdims=True)
        zs = z - m
        lse = jnp.log(jnp.sum(jnp.exp(zs), axis=1, keepdims=True))
        o_ref[...] = (zs - lse).astype(o_ref.dtype)


# ---------------------------------------------------------------------------
# Wrapper
# ---------------------------------------------------------------------------
def _round_up(x, m):
    return ((x + m - 1) // m) * m


def _choose_tm(n):
    """Largest row tile (multiple of 8) keeping the double-buffered (TM, N) bf16
    A block under ~8 MiB, so defaults fit on v5e (16 MiB) / v6e / v7x (32 MiB)."""
    n8 = _round_up(max(n, 8), 8)
    budget_rows = max(8, (4 * 1024 * 1024) // (n8 * 2))  # per-buffer budget ~4 MiB
    for tm in (512, 256, 128, 64, 32, 16, 8):
        if tm <= n8 and tm <= budget_rows:
            return tm
    return 8


def gcn_forward(a_hat, x, w1, b1, w2, b2):
    n, f_in = x.shape
    h = w1.shape[1]
    c = w2.shape[1]

    tm = _choose_tm(n)
    n_pad = _round_up(n, tm)
    f_pad = _round_up(f_in, 128)
    h_pad = _round_up(h, 128)
    c_pad = _round_up(c, 128)

    # Zero-pad + cast. Zero rows/cols are inert: they contribute nothing to the
    # matmuls, and padded class lanes are masked inside the log_softmax kernel.
    bf16 = jnp.bfloat16
    a_p = jnp.zeros((n_pad, n_pad), bf16).at[:n, :n].set(a_hat.astype(bf16))
    x_p = jnp.zeros((n_pad, f_pad), bf16).at[:n, :f_in].set(x.astype(bf16))
    w1_p = jnp.zeros((f_pad, h_pad), bf16).at[:f_in, :h].set(w1.astype(bf16))
    b1_p = jnp.zeros((1, h_pad), jnp.float32).at[:, :h].set(b1)
    w2_p = jnp.zeros((h_pad, c_pad), bf16).at[:h, :c].set(w2.astype(bf16))
    b2_p = jnp.zeros((1, c_pad), jnp.float32).at[:, :c].set(b2)

    grid = (n_pad // tm,)
    cparams = pltpu.CompilerParams(dimension_semantics=("parallel",))

    def project(xp, wp):
        f_cols = xp.shape[1]
        o_cols = wp.shape[1]
        return pl.pallas_call(
            project_kernel,
            out_shape=jax.ShapeDtypeStruct((n_pad, o_cols), bf16),
            grid=grid,
            in_specs=[
                pl.BlockSpec((tm, f_cols), lambda i: (i, 0)),      # row block of X / H1
                pl.BlockSpec((f_cols, o_cols), lambda i: (0, 0)),  # resident weight
            ],
            out_specs=pl.BlockSpec((tm, o_cols), lambda i: (i, 0)),
            compiler_params=cparams,
        )(xp, wp)

    def propagate(xw, bias, epilogue, num_valid, out_dtype):
        cols = xw.shape[1]
        kern = functools.partial(
            propagate_kernel, epilogue=epilogue, num_valid=num_valid
        )
        return pl.pallas_call(
            kern,
            out_shape=jax.ShapeDtypeStruct((n_pad, cols), out_dtype),
            grid=grid,
            in_specs=[
                pl.BlockSpec((tm, n_pad), lambda i: (i, 0)),   # A_hat row block (streamed)
                pl.BlockSpec((n_pad, cols), lambda i: (0, 0)),  # resident X@W / H1@W
                pl.BlockSpec((1, cols), lambda i: (0, 0)),      # resident bias
            ],
            out_specs=pl.BlockSpec((tm, cols), lambda i: (i, 0)),
            compiler_params=cparams,
        )(a_p, xw, bias)

    # --- layer 1: GCNConv(F_in -> H), relu ---
    xw1 = project(x_p, w1_p)                                    # (N_pad, H_pad) bf16
    h1 = propagate(xw1, b1_p, "relu", h_pad, bf16)              # (N_pad, H_pad) bf16

    # F.dropout(x, training=self.training): inference mode -> identity.
    # TODO(synk): training-mode dropout (pltpu.prng_random_bits mask) not emitted.

    # --- layer 2: GCNConv(H -> C), log_softmax over real classes ---
    hw2 = project(h1, w2_p)                                     # (N_pad, C_pad) bf16
    out_p = propagate(hw2, b2_p, "log_softmax", c, jnp.float32)  # (N_pad, C_pad) f32

    return out_p[:n, :c]


# ---------------------------------------------------------------------------
# Graph preprocessing (glue, not the hot path)
# ---------------------------------------------------------------------------
def build_normalized_adjacency(edge_index, num_nodes):
    """Dense D^{-1/2}(A+I)D^{-1/2} from a (2, E) edge_index (GCN normalization)."""
    src, dst = edge_index[0], edge_index[1]
    a = jnp.zeros((num_nodes, num_nodes), jnp.float32)
    a = a.at[dst, src].add(1.0)
    a = jnp.minimum(a, 1.0)                         # dedupe multi-edges
    a = a + jnp.eye(num_nodes, dtype=jnp.float32)   # self loops
    deg = jnp.sum(a, axis=1)
    d_inv_sqrt = jnp.where(deg > 0, 1.0 / jnp.sqrt(deg), 0.0)
    return d_inv_sqrt[:, None] * a * d_inv_sqrt[None, :]


if __name__ == "__main__":
    # Small synthetic "Cora-like" graph.
    N = 32          # num nodes
    F_IN = 16       # num_node_features
    HIDDEN = 32
    C = 8           # num_classes
    E = 64          # num directed edges

    key = jax.random.PRNGKey(0)
    k_x, k_e1, k_e2, k_w1, k_w2 = jax.random.split(key, 5)

    x = jax.random.normal(k_x, (N, F_IN), dtype=jnp.float32)

    # Random edges, made symmetric (undirected graph like Cora).
    src = jax.random.randint(k_e1, (E,), 0, N)
    dst = jax.random.randint(k_e2, (E,), 0, N)
    edge_index = jnp.stack(
        [jnp.concatenate([src, dst]), jnp.concatenate([dst, src])], axis=0
    )
    a_hat = build_normalized_adjacency(edge_index, N)

    # Deterministic GCNConv params: glorot-style weights, zero biases.
    w1 = jax.random.normal(k_w1, (F_IN, HIDDEN), jnp.float32) * (
        (2.0 / (F_IN + HIDDEN)) ** 0.5
    )
    b1 = jnp.zeros((1, HIDDEN), jnp.float32)
    w2 = jax.random.normal(k_w2, (HIDDEN, C), jnp.float32) * (
        (2.0 / (HIDDEN + C)) ** 0.5
    )
    b2 = jnp.zeros((1, C), jnp.float32)

    out = gcn_forward(a_hat, x, w1, b1, w2, b2)
    out = jax.block_until_ready(out)

    # Sanity check against a pure-JAX f32 reference of the same math
    # (bf16 inputs with f32 accumulation -> expect ~1e-2 level agreement).
    h1_ref = jnp.maximum(a_hat @ (x @ w1) + b1, 0.0)
    logits = a_hat @ (h1_ref @ w2) + b2
    ref = jax.nn.log_softmax(logits, axis=1)
    assert out.shape == (N, C)
    assert jnp.max(jnp.abs(out - ref)) < 5e-2, float(jnp.max(jnp.abs(out - ref)))

    print("KERNEL_OK")
</pallas_src>

<mosaic_0001>
module attributes {stable_mosaic.version = 11 : i64} {
  func.func @project_kernel(%arg0: i32, %arg1: memref<32x128xbf16, #tpu.memory_space<vmem>>, %arg2: memref<128x128xbf16, #tpu.memory_space<vmem>>, %arg3: memref<32x128xbf16, #tpu.memory_space<vmem>>) attributes {dimension_semantics = [#tpu.dimension_semantics<parallel>], iteration_bounds = array<i64: 1>, scalar_prefetch = 0 : i64, scratch_operands = 0 : i64, tpu.core_type = #tpu.core_type<tc>, window_params = [{transform_indices = @transform_0, window_bounds = array<i64: 32, 128>}, {pipeline_mode = #tpu.pipeline_mode<synchronous>, transform_indices = @transform_1, window_bounds = array<i64: 128, 128>}, {transform_indices = @transform_2, window_bounds = array<i64: 32, 128>}]} {
    %c0 = arith.constant 0 : index
    %c0_0 = arith.constant 0 : index
    %0 = vector.load %arg1[%c0, %c0_0] : memref<32x128xbf16, #tpu.memory_space<vmem>>, vector<32x128xbf16>
    %c0_1 = arith.constant 0 : index
    %c0_2 = arith.constant 0 : index
    %1 = vector.load %arg2[%c0_1, %c0_2] : memref<128x128xbf16, #tpu.memory_space<vmem>>, vector<128x128xbf16>
    %cst = arith.constant dense<0.000000e+00> : vector<32x128xf32>
    %2 = tpu.matmul %0, %1, %cst {dimension_numbers = #tpu.dot_dimension_numbers<[1], [0], [0], [1], [0, 0, 1, 1], [], []>} : vector<32x128xbf16>, vector<128x128xbf16>, vector<32x128xf32> -> vector<32x128xf32>
    %3 = arith.truncf %2 : vector<32x128xf32> to vector<32x128xbf16>
    %c0_3 = arith.constant 0 : index
    %c0_4 = arith.constant 0 : index
    %4 = vector.load %arg3[%c0_3, %c0_4] : memref<32x128xbf16, #tpu.memory_space<vmem>>, vector<32x128xbf16>
    tpu.vector_store %arg3[%c0_3, %c0_4], %3 {strides = array<i32>} : memref<32x128xbf16, #tpu.memory_space<vmem>>, vector<32x128xbf16>,
    return
  }
  func.func @transform_0(%arg0: i32) -> (i32, i32) {
    %c0_i32 = arith.constant 0 : i32
    %c0_i32_0 = arith.constant 0 : i32
    return %arg0, %c0_i32 : i32, i32
  }
  func.func @transform_1(%arg0: i32) -> (i32, i32) {
    %c0_i32 = arith.constant 0 : i32
    %c0_i32_0 = arith.constant 0 : i32
    %c0_i32_1 = arith.constant 0 : i32
    return %c0_i32, %c0_i32_0 : i32, i32
  }
  func.func @transform_2(%arg0: i32) -> (i32, i32) {
    %c0_i32 = arith.constant 0 : i32
    %c0_i32_0 = arith.constant 0 : i32
    return %arg0, %c0_i32 : i32, i32
  }
}

</mosaic_0001>

<bundles_post_ra>
// kernel: tpu_custom_call.1
= control target key start
LH: loop header
LB: loop body
LE: loop exit
PB: predicated region body
PF: predicated region fallthrough
CT: control target
= control target key end

     0   :  { %7 = vsyncpa [#allocation3], 0  ;;  %s419_s0 = inlined_call_operand.hbm [shape: bf16[32,128], index: 0, kind: input, shape index: {}]   ;;  %s420_s1 = inlined_call_operand.hbm [shape: bf16[128,128], index: 1, kind: input, shape index: {}]   ;;  %s421_s2 = inlined_call_operand.hbm [shape: bf16[32,128], index: 2, kind: output, shape index: {}]  }
   0x1   :  { %8 = vsyncpa [#allocation6], 0 }
   0x2   :  { %9 = vsyncpa [#allocation4], 0  ;;  %s354_s9 = smov [#allocation2]   ;;  %s282_s13 = scalar_lea.hbm %s419_s0, 256 }
   0x3   :  { %s15_s10 = sshll.u32 %s354_s9, 4  ;;  %p283_p0 = scmp.ne.s32.totalorder %s419_s0, %s282_s13  ;;  %s16_s10 = int_to_ptr.vmem [resolvable:$true] %s15_s10 }
   0x4   :  { %p286_p1 = scmp.lt.u32.totalorder %s282_s13, %s419_s0 }
   0x6   :  { %p288_p2 = pnand %p286_p1, %p283_p0 }
   0x8   :  { %291 = shalt.err (!%p288_p2)
}
   0x9   :  { %s292_s18 = scalar_lea.vmem %s16_s10, 256  ;;  %p297_p4 = scmp.lt.s32.totalorder %s16_s10, %s16_s10 }
   0xa   :  { %p293_p3 = scmp.ne.s32.totalorder %s16_s10, %s292_s18  ;;  %p298_p5 = scmp.lt.s32.totalorder %s292_s18, %s292_s18 }
   0xc   :  { %p299_p6 = por %p298_p5, %p297_p4 }
   0xe   :  { %p300_p7 = pnand %p299_p6, %p293_p3 }
  0x10   :  { %303 = shalt.err (!%p300_p7)
}
  0x11   :  { %s355_s19 = smov 64   ;;  %s356_s20 = smov 4  }
  0x12   :  { %21 = dma.hbm_to_vmem [thread:$0]  %s419_s0, 256, %s16_s10, [#allocation3], %s355_s19, %s355_s19, %s356_s20  }
  0x13   :  { %s357_s23 = smov [#allocation5]   ;;  %s304_s27 = scalar_lea.hbm %s420_s1, 1024 }
  0x14   :  { %s27_s24 = sshll.u32 %s357_s23, 4  ;;  %p305_p8 = scmp.ne.s32.totalorder %s420_s1, %s304_s27  ;;  %s28_s24 = int_to_ptr.vmem [resolvable:$true] %s27_s24 }
  0x15   :  { %p308_p9 = scmp.lt.u32.totalorder %s304_s27, %s420_s1 }
  0x17   :  { %p310_p10 = pnand %p308_p9, %p305_p8 }
  0x19   :  { %313 = shalt.err (!%p310_p10)
}
  0x1a   :  { %s314_s4 = scalar_lea.vmem %s28_s24, 1024  ;;  %p319_p12 = scmp.lt.s32.totalorder %s28_s24, %s28_s24 }
  0x1b   :  { %p315_p11 = scmp.ne.s32.totalorder %s28_s24, %s314_s4  ;;  %p320_p13 = scmp.lt.s32.totalorder %s314_s4, %s314_s4 }
  0x1d   :  { %p321_p0 = por %p320_p13, %p319_p12 }
  0x1f   :  { %p322_p1 = pnand %p321_p0, %p315_p11 }
  0x21   :  { %325 = shalt.err (!%p322_p1)
}
  0x22   :  { %33 = dma.hbm_to_vmem [thread:$0]  %s420_s1, 1024, %s28_s24, [#allocation6], %s355_s19, %s355_s19, %s356_s20  }
  0x23   :  { %348 = dma.done.wait [#allocation3], 256  }
  0x24   :  { %349 = vsyncadd [#allocation3], 4294967040 }
  0x25   :  { %350 = dma.done.wait [#allocation6], 1024  }
  0x26   :  { %351 = vsyncadd [#allocation6], 4294966272  ;;  %v272_v0 = vld [vmem:[#allocation5] sm:$0xff]   ;;  %v273_v1 = vld [vmem:[#allocation5 + $0x8] sm:$0xff]   ;;  %s358_s1 = smov [#allocation7]  }
  0x27   :  { %247 = vmatprep.subr.bf16.mxu0 %v272_v0  ;;  %v274_v2 = vld [vmem:[#allocation5 + $0x10] sm:$0xff]   ;;  %v275_v3 = vld [vmem:[#allocation5 + $0x18] sm:$0xff]   ;;  %v276_v5 = vld [vmem:[#allocation5 + $0x20] sm:$0xff]   ;;  %s195_s6 = sshll.u32 %s358_s1, 4  ;;  %s196_s6 = int_to_ptr.vmem [resolvable:$true] %s195_s6 }
  0x28   :  { %248 = vmatpush3.bf16.msra.mxu0 %v272_v0  ;;  %v280_v4 = vld [vmem:[#allocation2] sm:$0xff]   ;;  %v277_v6 = vld [vmem:[#allocation5 + $0x28] sm:$0xff]   ;;  %v279_v8 = vld [vmem:[#allocation5 + $0x38] sm:$0xff]   ;;  %s326_s7 = scalar_lea.vmem %s196_s6, 256  ;;  %p331_p3 = scmp.lt.s32.totalorder %s196_s6, %s196_s6 }
  0x29   :  { %249 = vmatprep.subr.bf16.mxu0 %v273_v1  ;;  %263 = vmatprep.mubr.bf16.mxu0 %v280_v4  ;;  %v278_v7 = vld [vmem:[#allocation5 + $0x30] sm:$0xff]   ;;  %v281_v9 = vld [vmem:[#allocation2 + $0x8] sm:$0xff]   ;;  %p327_p2 = scmp.ne.s32.totalorder %s196_s6, %s326_s7  ;;  %p332_p4 = scmp.lt.s32.totalorder %s326_s7, %s326_s7 }
  0x2b   :  { %p333_p5 = por %p332_p4, %p331_p3 }
  0x2c   :  { %250 = vmatpush3.bf16.msra.mxu0 %v273_v1 }
  0x2d   :  { %251 = vmatprep.subr.bf16.mxu0 %v274_v2  ;;  %p334_p6 = pnand %p333_p5, %p327_p2 }
  0x30   :  { %252 = vmatpush3.bf16.msra.mxu0 %v274_v2 }
  0x31   :  { %253 = vmatprep.subr.bf16.mxu0 %v275_v3 }
  0x34   :  { %254 = vmatpush3.bf16.msra.mxu0 %v275_v3 }
  0x35   :  { %255 = vmatprep.subr.bf16.mxu0 %v276_v5 }
  0x38   :  { %256 = vmatpush3.bf16.msra.mxu0 %v276_v5 }
  0x39   :  { %257 = vmatprep.subr.bf16.mxu0 %v277_v6 }
  0x3c   :  { %258 = vmatpush3.bf16.msra.mxu0 %v277_v6 }
  0x3d   :  { %259 = vmatprep.subr.bf16.mxu0 %v278_v7 }
  0x40   :  { %260 = vmatpush3.bf16.msra.mxu0 %v278_v7 }
  0x41   :  { %261 = vmatprep.subr.bf16.mxu0 %v279_v8 }
  0x44   :  { %262 = vmatpush3.bf16.msra.mxu0 %v279_v8 }
  0x47   :  { %264 = vmatmul.mubr.bf16.vlgmr.msra.gmra.mrb[0].mxu0 %v281_v9 }
 0x11a   :  { %v265_v10 = vpop.f32.mrb[0].mxu0 }
 0x11b   :  { %v155_v11 = vpop.f32.mrb[1].mxu0 }
 0x11c   :  { %v266_v12 = vpop.f32.mrb[2].mxu0 }
 0x11d   :  { %v234_v13 = vpack.c.bf16 %v266_v12, %v265_v10  ;;  %v158_v14 = vpop.f32.mrb[3].mxu0 }
 0x11e   :  { %v229_v15 = vpack.c.bf16 %v158_v14, %v155_v11 }
 0x11f   :  { %236 = vst [vmem:[#allocation7 + $0x8] sm:$0xff] %v234_v13  }
 0x120   :  { %230 = vst [vmem:[#allocation7] sm:$0xff] %v229_v15  }
 0x121   :  { %337 = shalt.err (!%p334_p6)
}
 0x122   :  { %s338_s10 = scalar_lea.hbm %s421_s2, 256 }
 0x123   :  { %p339_p7 = scmp.ne.s32.totalorder %s421_s2, %s338_s10  ;;  %p342_p8 = scmp.lt.u32.totalorder %s338_s10, %s421_s2 }
 0x125   :  { %p344_p9 = pnand %p342_p8, %p339_p7 }
 0x127   :  { %347 = shalt.err (!%p344_p9)
}
 0x128   :  { %201 = dma.vmem_to_hbm [thread:$0]  %s196_s6, 256, %s421_s2, [#allocation4], %s355_s19, %s355_s19, %s356_s20  }
 0x129   :  { %352 = dma.done.wait [#allocation4], 256  }
 0x12a   :  { %353 = vsyncadd [#allocation4], 4294967040 }
 0x12b   :  { %205 = vsyncpa [#allocation3], 1 }
 0x12c   :  { %206 = vsyncpa [#allocation6], 1 }
 0x12d   :  { %207 = vsyncpa [#allocation4], 1 }

</bundles_post_ra>
